<compile_context>
chip_gen: v7x
topology: tpu7x:2x2x1
jax: 0.10.0
libtpu: 0.0.40
codegen_flags: <defaults>
</compile_context>

<pallas_src>
import jax
import jax.numpy as jnp
from jax.experimental import pallas as pl
from jax.experimental.pallas import tpu as pltpu

IN_CHANNEL = 1
OUT_CHANNEL = 128
KERNEL_H = 17               # kernels[0]
FEATURES_DIM = 10
PAD = (KERNEL_H - 1) // 2   # 8
SEQ_LEN = 32                # window_size = defconstant.cutoff_seq_len (small synthetic value)
KHF = KERNEL_H * FEATURES_DIM   # 170 = folded contraction depth

# Batch tile: 128 keeps double-buffered (TB, S, 170)-f32 blocks (~4 MB each,
# lane-padded) well inside the default scoped VMEM on v5e/v6e/v7x while giving
# the MXU M = TB*S = 4096 rows per step.  Sweep upward (256-512) on v5e/v6e.
TB_MAX = 128


def _net_kernel(x_ref, w_ref, b_ref, o_ref):
    """One batch tile per grid step.

    x_ref: (TB, S, KH*F)   im2col patches for TB batch rows
    w_ref: (KH*F, OC)      folded conv weight
    b_ref: (1, OC)         bias
    o_ref: (TB, OC)        pooled features
    """
    tb, s, khf = x_ref.shape
    # Single K=170 contraction on the MXU: (TB*S, 170) x (170, 128).
    xm = x_ref[...].reshape(tb * s, khf)
    acc = jnp.dot(xm, w_ref[...], preferred_element_type=jnp.float32)  # (TB*S, OC)
    acc = acc.reshape(tb, s, OUT_CHANNEL)
    # MaxPool2d((S, 1), stride=1) == global max over the sequence axis.
    pooled = jnp.max(acc, axis=1)                                      # (TB, OC)
    # Bias is constant over the pooled axis and ReLU is monotone, so the
    # bias add + ReLU commute with the max -> do them on (TB, OC) only.
    o_ref[...] = jnp.maximum(pooled + b_ref[...], 0.0)


def net_forward(x, conv_w, conv_b, *, seq_len=SEQ_LEN):
    """x: (B, 1, S, F) float32 (NCHW, like PyTorch). Returns (B, 128)."""
    B = x.shape[0]
    assert x.shape == (B, IN_CHANNEL, seq_len, FEATURES_DIM)

    # --- wrapper glue (XLA): squeeze channel, pad seq, im2col, fold weights ---
    xs = x[:, 0, :, :]                                          # (B, S, F)
    xp = jnp.pad(xs, ((0, 0), (PAD, PAD), (0, 0)))              # (B, S+2P, F)
    # im2col: (B, S, KH*F), kh-major / f-minor ordering.
    patches = jnp.concatenate(
        [xp[:, kh:kh + seq_len, :] for kh in range(KERNEL_H)], axis=-1)
    # Folded weight: (OC, KH, F) -> (KH*F, OC), matching patch ordering.
    w2 = conv_w[:, 0, :, :].reshape(OUT_CHANNEL, KHF).T         # (170, 128)
    b2 = conv_b.reshape(1, OUT_CHANNEL)                         # (1, 128)

    # Batch tiling (pad B to a multiple of TB; padded rows are discarded).
    TB = min(B, TB_MAX)
    n_tiles = pl.cdiv(B, TB)
    B_pad = n_tiles * TB
    if B_pad != B:
        patches = jnp.pad(patches, ((0, B_pad - B), (0, 0), (0, 0)))

    out = pl.pallas_call(
        _net_kernel,
        out_shape=jax.ShapeDtypeStruct((B_pad, OUT_CHANNEL), jnp.float32),
        grid_spec=pltpu.PrefetchScalarGridSpec(
            num_scalar_prefetch=0,
            grid=(n_tiles,),
            in_specs=[
                pl.BlockSpec((TB, seq_len, KHF), lambda b: (b, 0, 0)),
                pl.BlockSpec((KHF, OUT_CHANNEL), lambda b: (0, 0)),
                pl.BlockSpec((1, OUT_CHANNEL), lambda b: (0, 0)),
            ],
            out_specs=pl.BlockSpec((TB, OUT_CHANNEL), lambda b: (b, 0)),
        ),
        compiler_params=pltpu.CompilerParams(
            dimension_semantics=("parallel",)),
    )(patches, w2, b2)

    return out[:B]   # == features.view(B, C*1*1)


def net_forward_ref(x, conv_w, conv_b, *, seq_len=SEQ_LEN):
    """Pure-JAX reference of the PyTorch forward (for verification)."""
    xs = x[:, 0, :, :]
    xp = jnp.pad(xs, ((0, 0), (PAD, PAD), (0, 0)))
    patches = jnp.stack([xp[:, kh:kh + seq_len, :] for kh in range(KERNEL_H)],
                        axis=2)                                  # (B, S, KH, F)
    conv = jnp.einsum("bskf,okf->bso", patches, conv_w[:, 0, :, :]) + conv_b
    conv = jnp.maximum(conv, 0.0)
    return jnp.max(conv, axis=1)                                 # (B, OC)


if __name__ == "__main__":
    key = jax.random.PRNGKey(0)
    kx, kw, kb = jax.random.split(key, 3)

    B = 2
    x = jax.random.normal(kx, (B, IN_CHANNEL, SEQ_LEN, FEATURES_DIM),
                          dtype=jnp.float32)

    # Deterministic parameter init (PyTorch-style uniform(-1/sqrt(fan_in), ...)).
    fan_in = IN_CHANNEL * KERNEL_H * FEATURES_DIM
    bound = 1.0 / (fan_in ** 0.5)
    conv_w = jax.random.uniform(kw, (OUT_CHANNEL, IN_CHANNEL, KERNEL_H,
                                     FEATURES_DIM),
                                minval=-bound, maxval=bound, dtype=jnp.float32)
    conv_b = jax.random.uniform(kb, (OUT_CHANNEL,),
                                minval=-bound, maxval=bound, dtype=jnp.float32)

    out = net_forward(x, conv_w, conv_b)
    out = jax.block_until_ready(out)

    ref = net_forward_ref(x, conv_w, conv_b)
    assert out.shape == (B, OUT_CHANNEL), out.shape
    assert jnp.allclose(out, ref, atol=1e-4, rtol=1e-4), \
        float(jnp.max(jnp.abs(out - ref)))

    print("KERNEL_OK")
</pallas_src>

<mosaic_0001>
module attributes {stable_mosaic.version = 11 : i64} {
  func.func @_net_kernel(%arg0: i32, %arg1: memref<2x32x170xf32, #tpu.memory_space<vmem>>, %arg2: memref<170x128xf32, #tpu.memory_space<vmem>>, %arg3: memref<1x128xf32, #tpu.memory_space<vmem>>, %arg4: memref<2x128xf32, #tpu.memory_space<vmem>>) attributes {dimension_semantics = [#tpu.dimension_semantics<parallel>], iteration_bounds = array<i64: 1>, scalar_prefetch = 0 : i64, scratch_operands = 0 : i64, tpu.core_type = #tpu.core_type<tc>, window_params = [{transform_indices = @transform_0, window_bounds = array<i64: 2, 32, 170>}, {pipeline_mode = #tpu.pipeline_mode<synchronous>, transform_indices = @transform_1, window_bounds = array<i64: 170, 128>}, {pipeline_mode = #tpu.pipeline_mode<synchronous>, transform_indices = @transform_2, window_bounds = array<i64: 1, 128>}, {transform_indices = @transform_3, window_bounds = array<i64: 2, 128>}]} {
    %c0 = arith.constant 0 : index
    %c0_0 = arith.constant 0 : index
    %c0_1 = arith.constant 0 : index
    %0 = vector.load %arg1[%c0, %c0_0, %c0_1] : memref<2x32x170xf32, #tpu.memory_space<vmem>>, vector<2x32x170xf32>
    %1 = vector.shape_cast %0 : vector<2x32x170xf32> to vector<64x170xf32>
    %c0_2 = arith.constant 0 : index
    %c0_3 = arith.constant 0 : index
    %2 = vector.load %arg2[%c0_2, %c0_3] : memref<170x128xf32, #tpu.memory_space<vmem>>, vector<170x128xf32>
    %cst = arith.constant dense<0.000000e+00> : vector<64x128xf32>
    %3 = tpu.matmul %1, %2, %cst {dimension_numbers = #tpu.dot_dimension_numbers<[1], [0], [0], [1], [0, 0, 1, 1], [], []>} : vector<64x170xf32>, vector<170x128xf32>, vector<64x128xf32> -> vector<64x128xf32>
    %4 = vector.shape_cast %3 : vector<64x128xf32> to vector<2x32x128xf32>
    %cst_4 = arith.constant dense<0xFF800000> : vector<2x128xf32>
    %5 = vector.multi_reduction <maximumf>, %4, %cst_4 [1] : vector<2x32x128xf32> to vector<2x128xf32>
    %c0_5 = arith.constant 0 : index
    %c0_6 = arith.constant 0 : index
    %6 = vector.load %arg3[%c0_5, %c0_6] : memref<1x128xf32, #tpu.memory_space<vmem>>, vector<1x128xf32>
    %7 = vector.broadcast %6 : vector<1x128xf32> to vector<2x128xf32>
    %8 = arith.addf %5, %7 : vector<2x128xf32>
    %cst_7 = arith.constant 0.000000e+00 : f32
    %9 = vector.broadcast %cst_7 : f32 to vector<2x128xf32>
    %10 = arith.maximumf %8, %9 : vector<2x128xf32>
    %c0_8 = arith.constant 0 : index
    %c0_9 = arith.constant 0 : index
    %11 = vector.load %arg4[%c0_8, %c0_9] : memref<2x128xf32, #tpu.memory_space<vmem>>, vector<2x128xf32>
    tpu.vector_store %arg4[%c0_8, %c0_9], %10 {strides = array<i32>} : memref<2x128xf32, #tpu.memory_space<vmem>>, vector<2x128xf32>,
    return
  }
  func.func @transform_0(%arg0: i32) -> (i32, i32, i32) {
    %c0_i32 = arith.constant 0 : i32
    %c0_i32_0 = arith.constant 0 : i32
    %c0_i32_1 = arith.constant 0 : i32
    return %arg0, %c0_i32, %c0_i32_0 : i32, i32, i32
  }
  func.func @transform_1(%arg0: i32) -> (i32, i32) {
    %c0_i32 = arith.constant 0 : i32
    %c0_i32_0 = arith.constant 0 : i32
    %c0_i32_1 = arith.constant 0 : i32
    return %c0_i32, %c0_i32_0 : i32, i32
  }
  func.func @transform_2(%arg0: i32) -> (i32, i32) {
    %c0_i32 = arith.constant 0 : i32
    %c0_i32_0 = arith.constant 0 : i32
    %c0_i32_1 = arith.constant 0 : i32
    return %c0_i32, %c0_i32_0 : i32, i32
  }
  func.func @transform_3(%arg0: i32) -> (i32, i32) {
    %c0_i32 = arith.constant 0 : i32
    %c0_i32_0 = arith.constant 0 : i32
    return %arg0, %c0_i32 : i32, i32
  }
}

</mosaic_0001>

<bundles_post_ra>
// kernel: tpu_custom_call.1
= control target key start
LH: loop header
LB: loop body
LE: loop exit
PB: predicated region body
PF: predicated region fallthrough
CT: control target
= control target key end

     0   :  { %8 = vsyncpa [#allocation3], 0  ;;  %s512_s0 = inlined_call_operand.hbm [shape: f32[2,32,170], index: 0, kind: input, shape index: {}]   ;;  %s513_s1 = inlined_call_operand.hbm [shape: f32[170,128], index: 1, kind: input, shape index: {}]   ;;  %s514_s2 = inlined_call_operand.vmem [shape: f32[1,128], index: 2, kind: input, shape index: {}]   ;;  %s515_s3 = inlined_call_operand.hbm [shape: f32[2,128], index: 3, kind: output, shape index: {}]  }
   0x1   :  { %9 = vsyncpa [#allocation6], 0 }
   0x2   :  { %10 = vsyncpa [#allocation4], 0  ;;  %s414_s12 = smov [#allocation2]   ;;  %s342_s16 = scalar_lea.hbm %s512_s0, 2048 }
   0x3   :  { %s16_s13 = sshll.u32 %s414_s12, 4  ;;  %p343_p0 = scmp.ne.s32.totalorder %s512_s0, %s342_s16  ;;  %s17_s13 = int_to_ptr.vmem [resolvable:$true] %s16_s13 }
   0x4   :  { %p346_p1 = scmp.lt.u32.totalorder %s342_s16, %s512_s0 }
   0x6   :  { %p348_p2 = pnand %p346_p1, %p343_p0 }
   0x8   :  { %351 = shalt.err (!%p348_p2)
}
   0x9   :  { %s352_s21 = scalar_lea.vmem %s17_s13, 2048  ;;  %p357_p4 = scmp.lt.s32.totalorder %s17_s13, %s17_s13 }
   0xa   :  { %p353_p3 = scmp.ne.s32.totalorder %s17_s13, %s352_s21  ;;  %p358_p5 = scmp.lt.s32.totalorder %s352_s21, %s352_s21 }
   0xc   :  { %p359_p6 = por %p358_p5, %p357_p4 }
   0xe   :  { %p360_p7 = pnand %p359_p6, %p353_p3 }
  0x10   :  { %363 = shalt.err (!%p360_p7)
}
  0x11   :  { %s415_s22 = smov 256   ;;  %s416_s23 = smov 16  }
  0x12   :  { %22 = dma.hbm_to_vmem [thread:$0]  %s512_s0, 2048, %s17_s13, [#allocation3], %s415_s22, %s415_s22, %s416_s23  }
  0x13   :  { %s417_s26 = smov [#allocation5]   ;;  %s364_s30 = scalar_lea.hbm %s513_s1, 2816 }
  0x14   :  { %s28_s27 = sshll.u32 %s417_s26, 4  ;;  %p365_p8 = scmp.ne.s32.totalorder %s513_s1, %s364_s30  ;;  %s29_s27 = int_to_ptr.vmem [resolvable:$true] %s28_s27 }
  0x15   :  { %p368_p9 = scmp.lt.u32.totalorder %s364_s30, %s513_s1 }
  0x17   :  { %p370_p10 = pnand %p368_p9, %p365_p8 }
  0x19   :  { %373 = shalt.err (!%p370_p10)
}
  0x1a   :  { %s374_s8 = scalar_lea.vmem %s29_s27, 2816  ;;  %p379_p12 = scmp.lt.s32.totalorder %s29_s27, %s29_s27 }
  0x1b   :  { %p375_p11 = scmp.ne.s32.totalorder %s29_s27, %s374_s8  ;;  %p380_p13 = scmp.lt.s32.totalorder %s374_s8, %s374_s8 }
  0x1d   :  { %p381_p0 = por %p380_p13, %p379_p12 }
  0x1f   :  { %p382_p1 = pnand %p381_p0, %p375_p11 }
  0x21   :  { %385 = shalt.err (!%p382_p1)
}
  0x22   :  { %s418_s0 = smov 128   ;;  %s419_s9 = smov 8  }
  0x23   :  { %34 = dma.hbm_to_vmem [thread:$0]  %s513_s1, 2816, %s29_s27, [#allocation6], %s418_s0, %s418_s0, %s419_s9  }
  0x24   :  { %408 = dma.done.wait [#allocation3], 2048  }
  0x25   :  { %409 = vsyncadd [#allocation3], 4294965248 }
  0x26   :  { %410 = dma.done.wait [#allocation6], 2816  }
  0x27   :  { %411 = vsyncadd [#allocation6], 4294964480  ;;  %v420_v0 = vmov 0.0|0.0   ;;  %v59_v1 = vld [vmem:[#allocation5] sm:$0xff]  ;;  %v60_v2 = vld [vmem:[#allocation5 + $0x8] sm:$0xff]  ;;  %vm81_vm0 = vcmask 343040  }
  0x28   :  { %277 = vmatprep.subr.bf16.mxu0 %v420_v0  ;;  %311 = vmatprep.subr.bf16.mxu1 %v420_v0  ;;  %v61_v3 = vld [vmem:[#allocation5 + $0x10] sm:$0xff]  ;;  %v278_v4 = vpack.c.bf16 %v60_v2, %v59_v1  ;;  %v62_v5 = vld [vmem:[#allocation5 + $0x18] sm:$0xff]  ;;  %v63_v7 = vld [vmem:[#allocation5 + $0x20] sm:$0xff]  ;;  %vm106_vm1 = vcmask 1041408   ;;  %vm421_vm2 = vmmov 1   ;;  %s422_s13 = smov [#allocation7]  }
  0x29   :  { %v281_v6 = vpack.c.bf16 %v62_v5, %v61_v3  ;;  %v64_v8 = vld [vmem:[#allocation5 + $0x28] sm:$0xff]  ;;  %v65_v12 = vld [vmem:[#allocation5 + $0x30] sm:$0xff]  ;;  %v66_v13 = vld [vmem:[#allocation5 + $0x38] sm:$0xff]  ;;  %s257_s14 = sshll.u32 %s422_s13, 4  ;;  %vm247_vm4 = vcmask 1041409   ;;  %s258_s14 = int_to_ptr.vmem [resolvable:$true] %s257_s14 }
  0x2a   :  { %279 = vmatpush1.bf16.msra.mxu0 %v278_v4  ;;  %322 = vmatpush1.bf16.msra.mxu1 %v278_v4  ;;  %v284_v9 = vpack.c.bf16 %v64_v8, %v63_v7  ;;  %v44_v10 = vld [vmem:[#allocation2 + $0x8] sm:$0xff]  ;;  %v287_v14 = vpack.c.bf16 %v66_v13, %v65_v12  ;;  %v67_v15 = vld [vmem:[#allocation5 + $0x40] sm:$0xff]  ;;  %v69_v18 = vld [vmem:[#allocation5 + $0x50] sm:$0xff]  ;;  %s386_s15 = scalar_lea.vmem %s258_s14, 32  ;;  %p391_p3 = scmp.lt.s32.totalorder %s258_s14, %s258_s14 }
  0x2b   :  { %280 = vmatprep.subr.bf16.mxu0 %v420_v0  ;;  %312 = vmatprep.subr.bf16.mxu1 %v420_v0  ;;  %v52_v11 = vld [vmem:[#allocation2 + $0x48] sm:$0xff]  ;;  %v70_v19 = vld [vmem:[#allocation5 + $0x58] sm:$0xff]  ;;  %v71_v21 = vld [vmem:[#allocation5 + $0x60] sm:$0xff]  ;;  %p387_p2 = scmp.ne.s32.totalorder %s258_s14, %s386_s15  ;;  %p392_p4 = scmp.lt.s32.totalorder %s386_s15, %s386_s15 }
  0x2c   :  { %268 = vmatprep.mubr.msk.f32.mxu0 %vm81_vm0, %v44_v10  ;;  %272 = vmatprep.mubr.msk.f32.mxu1 %vm81_vm0, %v52_v11  ;;  %v68_v16 = vld [vmem:[#allocation5 + $0x48] sm:$0xff]  ;;  %v293_v20 = vpack.c.bf16 %v70_v19, %v69_v18  ;;  %v73_v24 = vld [vmem:[#allocation5 + $0x70] sm:$0xff]  ;;  %v74_v25 = vld [vmem:[#allocation5 + $0x78] sm:$0xff] }
  0x2d   :  { %v290_v17 = vpack.c.bf16 %v68_v16, %v67_v15  ;;  %v72_v22 = vld [vmem:[#allocation5 + $0x68] sm:$0xff]  ;;  %v299_v26 = vpack.c.bf16 %v74_v25, %v73_v24  ;;  %v75_v27 = vld [vmem:[#allocation5 + $0x80] sm:$0xff]  ;;  %v77_v30 = vld [vmem:[#allocation5 + $0x90] sm:$0xff]  ;;  %p393_p5 = por %p392_p4, %p391_p3 }
  0x2e   :  { %282 = vmatpush1.bf16.msra.mxu0 %v281_v6  ;;  %323 = vmatpush1.bf16.msra.mxu1 %v281_v6  ;;  %v296_v23 = vpack.c.bf16 %v72_v22, %v71_v21  ;;  %v76_v28 = vld [vmem:[#allocation5 + $0x88] sm:$0xff]  ;;  %v78_v31 = vld [vmem:[#allocation5 + $0x98] sm:$0xff]  ;;  %v79_v33 = vld [vmem:[#allocation5 + $0xa0] sm:$0xff] }
  0x2f   :  { %283 = vmatprep.subr.bf16.mxu0 %v420_v0  ;;  %313 = vmatprep.subr.bf16.mxu1 %v420_v0  ;;  %v302_v29 = vpack.c.bf16 %v76_v28, %v75_v27  ;;  %v305_v32 = vpack.c.bf16 %v78_v31, %v77_v30  ;;  %v80_v34 = vld [vmem:[#allocation5 + $0xa8] sm:$0x3]  ;;  %vm309_vm3 = vmpackc.low %vm106_vm1, %vm421_vm2  ;;  %v43_v36 = vld [vmem:[#allocation2] sm:$0xff]  ;;  %p394_p6 = pnand %p393_p5, %p387_p2 }
  0x30   :  { %v308_v35 = vpack.c.bf16 %v80_v34, %v79_v33  ;;  %v51_v37 = vld [vmem:[#allocation2 + $0x40] sm:$0xff]  ;;  %v46_v38 = vld [vmem:[#allocation2 + $0x18] sm:$0xff]  ;;  %v45_v40 = vld [vmem:[#allocation2 + $0x10] sm:$0xff] }
  0x31   :  { %v54_v39 = vld [vmem:[#allocation2 + $0x58] sm:$0xff]  ;;  %v53_v41 = vld [vmem:[#allocation2 + $0x50] sm:$0xff]  ;;  %v48_v42 = vld [vmem:[#allocation2 + $0x28] sm:$0xff] }
  0x32   :  { %285 = vmatpush1.bf16.msra.mxu0 %v284_v9  ;;  %324 = vmatpush1.bf16.msra.mxu1 %v284_v9  ;;  %v56_v43 = vld [vmem:[#allocation2 + $0x68] sm:$0xff]  ;;  %v47_v44 = vld [vmem:[#allocation2 + $0x20] sm:$0xff]  ;;  %v50_v46 = vld [vmem:[#allocation2 + $0x38] sm:$0xff] }
  0x33   :  { %286 = vmatprep.subr.bf16.mxu0 %v420_v0  ;;  %314 = vmatprep.subr.bf16.mxu1 %v420_v0  ;;  %v55_v45 = vld [vmem:[#allocation2 + $0x60] sm:$0xff]  ;;  %v58_v47 = vld [vmem:[#allocation2 + $0x78] sm:$0xff]  ;;  %v49_v48 = vld [vmem:[#allocation2 + $0x30] sm:$0xff] }
  0x34   :  { %v57_v49 = vld [vmem:[#allocation2 + $0x70] sm:$0xff]  ;;  %v276_v18 = vld [vmem:[%s514_s2] ss:$0 sm:$0xff] }
  0x36   :  { %288 = vmatpush1.bf16.msra.mxu0 %v287_v14  ;;  %325 = vmatpush1.bf16.msra.mxu1 %v287_v14 }
  0x37   :  { %289 = vmatprep.subr.bf16.mxu0 %v420_v0  ;;  %315 = vmatprep.subr.bf16.mxu1 %v420_v0 }
  0x3a   :  { %291 = vmatpush1.bf16.msra.mxu0 %v290_v17  ;;  %326 = vmatpush1.bf16.msra.mxu1 %v290_v17 }
  0x3b   :  { %292 = vmatprep.subr.bf16.mxu0 %v420_v0  ;;  %316 = vmatprep.subr.bf16.mxu1 %v420_v0 }
  0x3e   :  { %294 = vmatpush1.bf16.msra.mxu0 %v293_v20  ;;  %327 = vmatpush1.bf16.msra.mxu1 %v293_v20 }
  0x3f   :  { %295 = vmatprep.subr.bf16.mxu0 %v420_v0  ;;  %317 = vmatprep.subr.bf16.mxu1 %v420_v0 }
  0x42   :  { %297 = vmatpush1.bf16.msra.mxu0 %v296_v23  ;;  %328 = vmatpush1.bf16.msra.mxu1 %v296_v23 }
  0x43   :  { %298 = vmatprep.subr.bf16.mxu0 %v420_v0  ;;  %318 = vmatprep.subr.bf16.mxu1 %v420_v0 }
  0x46   :  { %300 = vmatpush1.bf16.msra.mxu0 %v299_v26  ;;  %329 = vmatpush1.bf16.msra.mxu1 %v299_v26 }
  0x47   :  { %301 = vmatprep.subr.bf16.mxu0 %v420_v0  ;;  %319 = vmatprep.subr.bf16.mxu1 %v420_v0 }
  0x4a   :  { %303 = vmatpush1.bf16.msra.mxu0 %v302_v29  ;;  %330 = vmatpush1.bf16.msra.mxu1 %v302_v29 }
  0x4b   :  { %304 = vmatprep.subr.bf16.mxu0 %v420_v0  ;;  %320 = vmatprep.subr.bf16.mxu1 %v420_v0 }
  0x4e   :  { %306 = vmatpush1.bf16.msra.mxu0 %v305_v32  ;;  %331 = vmatpush1.bf16.msra.mxu1 %v305_v32 }
  0x4f   :  { %307 = vmatprep.subr.bf16.mxu0 %v420_v0  ;;  %321 = vmatprep.subr.bf16.mxu1 %v420_v0 }
  0x52   :  { %310 = vmatpush1.bf16.msk.msra.mxu0 %vm309_vm3, %v308_v35  ;;  %332 = vmatpush1.bf16.msk.msra.mxu1 %vm309_vm3, %v308_v35 }
  0x55   :  { %175 = vmatmul.mubr.f32.vlgmr.msra.gmra.mrb[0].mxu0 %v43_v36  ;;  %195 = vmatmul.mubr.f32.vlgmr.msra.gmra.mrb[0].mxu1 %v51_v37 }
  0x56   :  { %269 = vmatprep.mubr.msk.f32.mxu0 %vm81_vm0, %v46_v38  ;;  %273 = vmatprep.mubr.msk.f32.mxu1 %vm81_vm0, %v54_v39 }
  0x59   :  { %180 = vmatmul.mubr.f32.gmra.mrb[2].mxu0 %v45_v40  ;;  %200 = vmatmul.mubr.f32.gmra.mrb[2].mxu1 %v53_v41 }
  0x5a   :  { %270 = vmatprep.mubr.msk.f32.mxu0 %vm81_vm0, %v48_v42  ;;  %274 = vmatprep.mubr.msk.f32.mxu1 %vm81_vm0, %v56_v43 }
  0x5d   :  { %185 = vmatmul.mubr.f32.gmra.mrb[4].mxu0 %v47_v44  ;;  %205 = vmatmul.mubr.f32.gmra.mrb[4].mxu1 %v55_v45 }
  0x5e   :  { %271 = vmatprep.mubr.msk.f32.mxu0 %vm81_vm0, %v50_v46  ;;  %275 = vmatprep.mubr.msk.f32.mxu1 %vm81_vm0, %v58_v47 }
  0x61   :  { %190 = vmatmul.mubr.f32.gmra.mrb[6].mxu0 %v49_v48  ;;  %210 = vmatmul.mubr.f32.gmra.mrb[6].mxu1 %v57_v49 }
 0x128   :  { %v196_v50 = vpop.f32.mrb[0].mxu1  ;;  %v176_v51 = vpop.f32.mrb[0].mxu0 }
 0x129   :  { %v198_v52 = vpop.f32.mrb[1].mxu1  ;;  %v178_v53 = vpop.f32.mrb[1].mxu0 }
 0x12c   :  { %v201_v54 = vpop.f32.mrb[2].mxu1  ;;  %v181_v55 = vpop.f32.mrb[2].mxu0 }
 0x12d   :  { %v203_v56 = vpop.f32.mrb[3].mxu1  ;;  %v183_v57 = vpop.f32.mrb[3].mxu0 }
 0x130   :  { %v186_v58 = vpop.f32.mrb[4].mxu0  ;;  %v206_v59 = vpop.f32.mrb[4].mxu1 }
 0x131   :  { %v215_v60 = vmax.f32 %v176_v51, %v186_v58  ;;  %v224_v61 = vmax.f32 %v196_v50, %v206_v59  ;;  %v208_v62 = vpop.f32.mrb[5].mxu1  ;;  %v188_v63 = vpop.f32.mrb[5].mxu0 }
 0x134   :  { %v191_v0 = vpop.f32.mrb[6].mxu0  ;;  %v211_v1 = vpop.f32.mrb[6].mxu1 }
 0x135   :  { %v216_v2 = vmax.f32 %v181_v55, %v191_v0  ;;  %v225_v3 = vmax.f32 %v201_v54, %v211_v1  ;;  %v213_v4 = vpop.f32.mrb[7].mxu1  ;;  %v193_v5 = vpop.f32.mrb[7].mxu0 }
 0x137   :  { %v217_v6 = vmax.f32 %v215_v60, %v216_v2  ;;  %v226_v7 = vmax.f32 %v224_v61, %v225_v3 }
 0x139   :  { %v218_v8 = vrot.slane %v217_v6, 4  ;;  %v227_v9 = vrot.slane %v226_v7, 4 }
 0x13b   :  { %v219_v10 = vmax.f32 %v217_v6, %v218_v8  ;;  %v228_v11 = vmax.f32 %v226_v7, %v227_v9 }
 0x13d   :  { %v220_v12 = vrot.slane %v219_v10, 2  ;;  %v229_v13 = vrot.slane %v228_v11, 2 }
 0x13f   :  { %v221_v14 = vmax.f32 %v219_v10, %v220_v12  ;;  %v230_v15 = vmax.f32 %v228_v11, %v229_v13 }
 0x141   :  { %v222_v16 = vrot.slane %v221_v14, 1  ;;  %v231_v17 = vrot.slane %v230_v15, 1 }
 0x143   :  { %v223_v19 = vmax.f32 %v221_v14, %v222_v16  ;;  %v232_v20 = vmax.f32 %v230_v15, %v231_v17 }
 0x145   :  { %v240_v21 = vadd.f32 %v276_v18, %v223_v19  ;;  %v241_v22 = vadd.f32 %v276_v18, %v232_v20 }
 0x147   :  { %v243_v23 = vmax.f32 %v241_v22, 0.0  ;;  %v242_v24 = vmax.f32 %v240_v21, 0.0 }
 0x149   :  { %v246_v25 = vrot.slane %v243_v23, 7 }
 0x14b   :  { %v248_v26 = vsel %vm247_vm4, %v246_v25, %v242_v24 }
 0x14c   :  { %250 = vst [vmem:[#allocation7] sm:$0x3] %v248_v26 }
 0x14d   :  { %397 = shalt.err (!%p394_p6)
}
 0x14e   :  { %s398_s17 = scalar_lea.hbm %s515_s3, 32 }
 0x14f   :  { %p399_p7 = scmp.ne.s32.totalorder %s515_s3, %s398_s17  ;;  %p402_p8 = scmp.lt.u32.totalorder %s398_s17, %s515_s3 }
 0x151   :  { %p404_p9 = pnand %p402_p8, %p399_p7 }
 0x153   :  { %407 = shalt.err (!%p404_p9)
}
 0x154   :  { %260 = dma.vmem_to_hbm [thread:$0]  %s258_s14, 32, %s515_s3, [#allocation4]  }
 0x155   :  { %412 = dma.done.wait [#allocation4], 32  }
 0x156   :  { %413 = vsyncadd [#allocation4], 4294967264 }
 0x157   :  { %264 = vsyncpa [#allocation3], 1 }
 0x158   :  { %265 = vsyncpa [#allocation6], 1 }
 0x159   :  { %266 = vsyncpa [#allocation4], 1 }

</bundles_post_ra>
